<compile_context>
chip_gen: v7x
topology: tpu7x:2x2x1
jax: 0.10.0
libtpu: 0.0.40
codegen_flags: <defaults>
</compile_context>

<pallas_src>
import functools

import jax
import jax.numpy as jnp
from jax.experimental import pallas as pl
from jax.experimental.pallas import tpu as pltpu

_LANES = 128


def _ce_kernel(logits_ref, target_ref, loss_ref, *, ignore_index, num_classes):
    """Per-pixel cross-entropy with ignore_index masking.

    logits_ref: [C, rows, 128] block (input dtype; cast to f32 in-kernel)
    target_ref: [rows, 128] i32 block
    loss_ref:   [rows, 128] f32 block (0 where target == ignore_index)
    """
    t = target_ref[...]                                    # [rows, 128] int32

    # Pass 1: running max over class planes + label gather, all dense (8,128)
    # vregs on the VPU (no sublane/XLU reduction, no [C,T] iota gather).
    x0 = logits_ref[0].astype(jnp.float32)                 # [rows, 128]
    m = x0
    x_t = jnp.where(t == 0, x0, 0.0)
    for c in range(1, num_classes):
        xc = logits_ref[c].astype(jnp.float32)
        m = jnp.maximum(m, xc)
        x_t = jnp.where(t == c, xc, x_t)

    # Pass 2: stable sum of exp (exactly one exp per element, EUP).
    s = jnp.zeros_like(m)
    for c in range(num_classes):
        s = s + jnp.exp(logits_ref[c].astype(jnp.float32) - m)

    loss = m + jnp.log(s) - x_t                            # log-sum-exp - x[target]
    valid = t != ignore_index
    # TODO(synk): per-class `weight` tensor (module default weight=None) not implemented.
    loss_ref[...] = jnp.where(valid, loss, 0.0)


def _pick_rows_per_block(total_rows, max_rows):
    """Largest multiple-of-8 divisor of total_rows that is <= max_rows; else full."""
    best = None
    r = 8
    while r <= min(max_rows, total_rows):
        if total_rows % r == 0:
            best = r
        r += 8
    if best is None:
        best = total_rows  # full extent along this dim is always a legal block
    return best


def per_pixel_cross_entropy(
    logits_nchw,
    target_bhw,
    *,
    ignore_index=-100,
    max_pixels_per_block=4096,          # tuned lane budget per grid step (sweepable)
    vmem_budget_bytes=8 * 1024 * 1024,  # cap per logits buffer (double-buffered)
):
    """Returns the flat per-pixel loss vector [B*H*W] (reduction='none' semantics)."""
    B, C, H, W = logits_nchw.shape
    HW = H * W

    # Free reshapes only: NCHW -> [B, C, HW] -> [B, C, HW/128, 128].
    x = logits_nchw.reshape(B, C, HW)
    t = target_bhw.reshape(B, HW).astype(jnp.int32)

    pad = (-HW) % _LANES
    if pad:
        x = jnp.pad(x, ((0, 0), (0, 0), (0, pad)))
        t = jnp.pad(t, ((0, 0), (0, pad)), constant_values=ignore_index)
    HWp = HW + pad
    total_rows = HWp // _LANES

    x = x.reshape(B, C, total_rows, _LANES)
    t = t.reshape(B, total_rows, _LANES)

    itemsize = jnp.dtype(x.dtype).itemsize
    max_rows_vmem = max(8, vmem_budget_bytes // (C * _LANES * itemsize))
    max_rows = min(max(max_pixels_per_block // _LANES, 8), max_rows_vmem)
    rows = _pick_rows_per_block(total_rows, max_rows)

    grid = (B, total_rows // rows)

    loss = pl.pallas_call(
        functools.partial(_ce_kernel, ignore_index=ignore_index, num_classes=C),
        out_shape=jax.ShapeDtypeStruct((B, total_rows, _LANES), jnp.float32),
        grid=grid,
        in_specs=[
            pl.BlockSpec((pl.Squeezed(), C, rows, _LANES), lambda b, i: (b, 0, i, 0)),
            pl.BlockSpec((pl.Squeezed(), rows, _LANES), lambda b, i: (b, i, 0)),
        ],
        out_specs=pl.BlockSpec((pl.Squeezed(), rows, _LANES), lambda b, i: (b, i, 0)),
        compiler_params=pltpu.CompilerParams(
            dimension_semantics=("parallel", "parallel"),
        ),
    )(x, t)

    # Drop lane padding and flatten to [B*H*W].
    return loss.reshape(B, HWp)[:, :HW].reshape(-1)


def topk_cross_entropy_loss(
    logits_nchw,
    target_bhw,
    *,
    top_k,
    ignore_index=-100,
    approximate_topk=False,
):
    """Forward pass of TopKCrossEntropyLoss (weight=None)."""
    assert 0 < top_k <= 1.0
    loss_pixel = per_pixel_cross_entropy(
        logits_nchw, target_bhw, ignore_index=ignore_index
    )
    if top_k == 1:
        # Matches torch: reduction='none' then .mean() over ALL pixels
        # (ignored pixels contribute 0 to the sum but count in the denominator).
        return jnp.mean(loss_pixel)
    k = int(top_k * loss_pixel.size)
    if approximate_topk:
        # Cheaper selection for very large P (not bit-exact vs torch.topk).
        top_vals, _ = jax.lax.approx_max_k(loss_pixel, k)
    else:
        top_vals, _ = jax.lax.top_k(loss_pixel, k)
    return jnp.mean(top_vals)


def _reference(logits_nchw, target_bhw, *, top_k, ignore_index=-100):
    """Pure-JAX reference mirroring torch.nn.CrossEntropyLoss(reduction='none')."""
    B, C, H, W = logits_nchw.shape
    x = jnp.transpose(logits_nchw, (0, 2, 3, 1)).reshape(-1, C).astype(jnp.float32)
    t = target_bhw.reshape(-1).astype(jnp.int32)
    lse = jax.nn.logsumexp(x, axis=-1)
    x_t = jnp.take_along_axis(x, jnp.clip(t, 0, C - 1)[:, None], axis=-1)[:, 0]
    loss = jnp.where(t != ignore_index, lse - x_t, 0.0)
    if top_k == 1:
        return jnp.mean(loss)
    k = int(top_k * loss.size)
    return jnp.mean(jax.lax.top_k(loss, k)[0])


if __name__ == "__main__":
    key = jax.random.PRNGKey(0)
    k1, k2, k3 = jax.random.split(key, 3)

    B, C, H, W = 2, 4, 16, 16
    ignore_index = -100
    top_k = 0.25

    logits = jax.random.normal(k1, (B, C, H, W), dtype=jnp.float32)
    target = jax.random.randint(k2, (B, H, W), 0, C, dtype=jnp.int32)
    # sprinkle some ignored pixels
    ignore_mask = jax.random.bernoulli(k3, 0.1, (B, H, W))
    target = jnp.where(ignore_mask, ignore_index, target)

    out = topk_cross_entropy_loss(
        logits, target, top_k=top_k, ignore_index=ignore_index
    )
    out = jax.block_until_ready(out)

    out_full = topk_cross_entropy_loss(
        logits, target, top_k=1.0, ignore_index=ignore_index
    )
    out_full = jax.block_until_ready(out_full)

    ref = _reference(logits, target, top_k=top_k, ignore_index=ignore_index)
    ref_full = _reference(logits, target, top_k=1.0, ignore_index=ignore_index)

    assert jnp.allclose(out, ref, atol=1e-5, rtol=1e-5), (out, ref)
    assert jnp.allclose(out_full, ref_full, atol=1e-5, rtol=1e-5), (out_full, ref_full)

    # Exercise the non-multiple-of-128 spatial path (lane padding + slice-back).
    Hp, Wp = 10, 10
    logits_p = jax.random.normal(k1, (B, C, Hp, Wp), dtype=jnp.float32)
    target_p = jax.random.randint(k2, (B, Hp, Wp), 0, C, dtype=jnp.int32)
    out_p = jax.block_until_ready(
        topk_cross_entropy_loss(logits_p, target_p, top_k=0.5,
                                ignore_index=ignore_index)
    )
    ref_p = _reference(logits_p, target_p, top_k=0.5, ignore_index=ignore_index)
    assert jnp.allclose(out_p, ref_p, atol=1e-5, rtol=1e-5), (out_p, ref_p)

    print("KERNEL_OK")
</pallas_src>

<mosaic_0001>
module attributes {stable_mosaic.version = 11 : i64} {
  func.func @_ce_kernel(%arg0: i32, %arg1: i32, %arg2: memref<1x4x2x128xf32, #tpu.memory_space<vmem>>, %arg3: memref<1x2x128xi32, #tpu.memory_space<vmem>>, %arg4: memref<1x2x128xf32, #tpu.memory_space<vmem>>) attributes {dimension_semantics = [#tpu.dimension_semantics<parallel>, #tpu.dimension_semantics<parallel>], iteration_bounds = array<i64: 2, 1>, scalar_prefetch = 0 : i64, scratch_operands = 0 : i64, tpu.core_type = #tpu.core_type<tc>, window_params = [{transform_indices = @transform_0, window_bounds = array<i64: 1, 4, 2, 128>}, {transform_indices = @transform_1, window_bounds = array<i64: 1, 2, 128>}, {transform_indices = @transform_2, window_bounds = array<i64: 1, 2, 128>}]} {
    %c0 = arith.constant 0 : index
    %c0_0 = arith.constant 0 : index
    %c0_1 = arith.constant 0 : index
    %0 = vector.load %arg3[%c0, %c0_0, %c0_1] : memref<1x2x128xi32, #tpu.memory_space<vmem>>, vector<1x2x128xi32>
    %1 = vector.shape_cast %0 : vector<1x2x128xi32> to vector<2x128xi32>
    %c0_2 = arith.constant 0 : index
    %c0_3 = arith.constant 0 : index
    %c0_4 = arith.constant 0 : index
    %c0_5 = arith.constant 0 : index
    %2 = vector.load %arg2[%c0_2, %c0_3, %c0_4, %c0_5] : memref<1x4x2x128xf32, #tpu.memory_space<vmem>>, vector<1x1x2x128xf32>
    %3 = vector.shape_cast %2 : vector<1x1x2x128xf32> to vector<2x128xf32>
    %c0_i32 = arith.constant 0 : i32
    %4 = vector.broadcast %c0_i32 : i32 to vector<2x128xi32>
    %5 = arith.cmpi eq, %1, %4 : vector<2x128xi32>
    %cst = arith.constant 0.000000e+00 : f32
    %6 = vector.broadcast %cst : f32 to vector<2x128xf32>
    %7 = arith.select %5, %3, %6 : vector<2x128xi1>, vector<2x128xf32>
    %c0_6 = arith.constant 0 : index
    %c1 = arith.constant 1 : index
    %c0_7 = arith.constant 0 : index
    %c0_8 = arith.constant 0 : index
    %8 = vector.load %arg2[%c0_6, %c1, %c0_7, %c0_8] : memref<1x4x2x128xf32, #tpu.memory_space<vmem>>, vector<1x1x2x128xf32>
    %9 = vector.shape_cast %8 : vector<1x1x2x128xf32> to vector<2x128xf32>
    %10 = arith.maximumf %3, %9 : vector<2x128xf32>
    %c1_i32 = arith.constant 1 : i32
    %11 = vector.broadcast %c1_i32 : i32 to vector<2x128xi32>
    %12 = arith.cmpi eq, %1, %11 : vector<2x128xi32>
    %13 = arith.select %12, %9, %7 : vector<2x128xi1>, vector<2x128xf32>
    %c0_9 = arith.constant 0 : index
    %c2 = arith.constant 2 : index
    %c0_10 = arith.constant 0 : index
    %c0_11 = arith.constant 0 : index
    %14 = vector.load %arg2[%c0_9, %c2, %c0_10, %c0_11] : memref<1x4x2x128xf32, #tpu.memory_space<vmem>>, vector<1x1x2x128xf32>
    %15 = vector.shape_cast %14 : vector<1x1x2x128xf32> to vector<2x128xf32>
    %16 = arith.maximumf %10, %15 : vector<2x128xf32>
    %c2_i32 = arith.constant 2 : i32
    %17 = vector.broadcast %c2_i32 : i32 to vector<2x128xi32>
    %18 = arith.cmpi eq, %1, %17 : vector<2x128xi32>
    %19 = arith.select %18, %15, %13 : vector<2x128xi1>, vector<2x128xf32>
    %c0_12 = arith.constant 0 : index
    %c3 = arith.constant 3 : index
    %c0_13 = arith.constant 0 : index
    %c0_14 = arith.constant 0 : index
    %20 = vector.load %arg2[%c0_12, %c3, %c0_13, %c0_14] : memref<1x4x2x128xf32, #tpu.memory_space<vmem>>, vector<1x1x2x128xf32>
    %21 = vector.shape_cast %20 : vector<1x1x2x128xf32> to vector<2x128xf32>
    %22 = arith.maximumf %16, %21 : vector<2x128xf32>
    %c3_i32 = arith.constant 3 : i32
    %23 = vector.broadcast %c3_i32 : i32 to vector<2x128xi32>
    %24 = arith.cmpi eq, %1, %23 : vector<2x128xi32>
    %25 = arith.select %24, %21, %19 : vector<2x128xi1>, vector<2x128xf32>
    %cst_15 = arith.constant 0.000000e+00 : f32
    %26 = vector.broadcast %cst_15 : f32 to vector<2x128xf32>
    %c0_16 = arith.constant 0 : index
    %c0_17 = arith.constant 0 : index
    %c0_18 = arith.constant 0 : index
    %c0_19 = arith.constant 0 : index
    %27 = vector.load %arg2[%c0_16, %c0_17, %c0_18, %c0_19] : memref<1x4x2x128xf32, #tpu.memory_space<vmem>>, vector<1x1x2x128xf32>
    %28 = vector.shape_cast %27 : vector<1x1x2x128xf32> to vector<2x128xf32>
    %29 = arith.subf %28, %22 : vector<2x128xf32>
    %30 = math.exp %29 : vector<2x128xf32>
    %31 = arith.addf %26, %30 : vector<2x128xf32>
    %c0_20 = arith.constant 0 : index
    %c1_21 = arith.constant 1 : index
    %c0_22 = arith.constant 0 : index
    %c0_23 = arith.constant 0 : index
    %32 = vector.load %arg2[%c0_20, %c1_21, %c0_22, %c0_23] : memref<1x4x2x128xf32, #tpu.memory_space<vmem>>, vector<1x1x2x128xf32>
    %33 = vector.shape_cast %32 : vector<1x1x2x128xf32> to vector<2x128xf32>
    %34 = arith.subf %33, %22 : vector<2x128xf32>
    %35 = math.exp %34 : vector<2x128xf32>
    %36 = arith.addf %31, %35 : vector<2x128xf32>
    %c0_24 = arith.constant 0 : index
    %c2_25 = arith.constant 2 : index
    %c0_26 = arith.constant 0 : index
    %c0_27 = arith.constant 0 : index
    %37 = vector.load %arg2[%c0_24, %c2_25, %c0_26, %c0_27] : memref<1x4x2x128xf32, #tpu.memory_space<vmem>>, vector<1x1x2x128xf32>
    %38 = vector.shape_cast %37 : vector<1x1x2x128xf32> to vector<2x128xf32>
    %39 = arith.subf %38, %22 : vector<2x128xf32>
    %40 = math.exp %39 : vector<2x128xf32>
    %41 = arith.addf %36, %40 : vector<2x128xf32>
    %c0_28 = arith.constant 0 : index
    %c3_29 = arith.constant 3 : index
    %c0_30 = arith.constant 0 : index
    %c0_31 = arith.constant 0 : index
    %42 = vector.load %arg2[%c0_28, %c3_29, %c0_30, %c0_31] : memref<1x4x2x128xf32, #tpu.memory_space<vmem>>, vector<1x1x2x128xf32>
    %43 = vector.shape_cast %42 : vector<1x1x2x128xf32> to vector<2x128xf32>
    %44 = arith.subf %43, %22 : vector<2x128xf32>
    %45 = math.exp %44 : vector<2x128xf32>
    %46 = arith.addf %41, %45 : vector<2x128xf32>
    %47 = math.log %46 : vector<2x128xf32>
    %48 = arith.addf %22, %47 : vector<2x128xf32>
    %49 = arith.subf %48, %25 : vector<2x128xf32>
    %c-100_i32 = arith.constant -100 : i32
    %50 = vector.broadcast %c-100_i32 : i32 to vector<2x128xi32>
    %51 = arith.cmpi ne, %1, %50 : vector<2x128xi32>
    %cst_32 = arith.constant 0.000000e+00 : f32
    %52 = vector.broadcast %cst_32 : f32 to vector<2x128xf32>
    %53 = arith.select %51, %49, %52 : vector<2x128xi1>, vector<2x128xf32>
    %c0_33 = arith.constant 0 : index
    %c0_34 = arith.constant 0 : index
    %c0_35 = arith.constant 0 : index
    %54 = vector.load %arg4[%c0_33, %c0_34, %c0_35] : memref<1x2x128xf32, #tpu.memory_space<vmem>>, vector<1x2x128xf32>
    %55 = vector.shape_cast %54 : vector<1x2x128xf32> to vector<2x128xf32>
    %56 = vector.shape_cast %53 : vector<2x128xf32> to vector<1x2x128xf32>
    tpu.vector_store %arg4[%c0_33, %c0_34, %c0_35], %56 {strides = array<i32>} : memref<1x2x128xf32, #tpu.memory_space<vmem>>, vector<1x2x128xf32>,
    return
  }
  func.func @transform_0(%arg0: i32, %arg1: i32) -> (i32, i32, i32, i32) {
    %c0_i32 = arith.constant 0 : i32
    %c0_i32_0 = arith.constant 0 : i32
    %c0_i32_1 = arith.constant 0 : i32
    return %arg0, %c0_i32, %arg1, %c0_i32_0 : i32, i32, i32, i32
  }
  func.func @transform_1(%arg0: i32, %arg1: i32) -> (i32, i32, i32) {
    %c0_i32 = arith.constant 0 : i32
    %c0_i32_0 = arith.constant 0 : i32
    return %arg0, %arg1, %c0_i32 : i32, i32, i32
  }
  func.func @transform_2(%arg0: i32, %arg1: i32) -> (i32, i32, i32) {
    %c0_i32 = arith.constant 0 : i32
    %c0_i32_0 = arith.constant 0 : i32
    return %arg0, %arg1, %c0_i32 : i32, i32, i32
  }
}

</mosaic_0001>

<bundles_post_ra>
// kernel: tpu_custom_call.1
= control target key start
LH: loop header
LB: loop body
LE: loop exit
PB: predicated region body
PF: predicated region fallthrough
CT: control target
= control target key end

     0   :  { %7 = vsyncpa [#allocation3], 0  ;;  %s868_s0 = inlined_call_operand.hbm [shape: f32[2,4,2,128], index: 0, kind: input, shape index: {}]   ;;  %s869_s1 = inlined_call_operand.hbm [shape: s32[2,2,128], index: 1, kind: input, shape index: {}]   ;;  %s870_s2 = inlined_call_operand.hbm [shape: f32[2,2,128], index: 2, kind: output, shape index: {}]  }
   0x1   :  { %9 = vsyncpa [#allocation3 + $0x1], 0 }
   0x2   :  { %10 = vsyncpa [#allocation6], 0 }
   0x3   :  { %12 = vsyncpa [#allocation6 + $0x1], 0 }
   0x4   :  { %13 = vsyncpa [#allocation4], 0 }
   0x5   :  { %15 = vsyncpa [#allocation4 + $0x1], 0  ;;  %s649_s9 = smov 0   ;;  %s651_s10 = smov 0  }
   0x6   :  { %s653_s11 = smov 0   ;;  %s655_s12 = smov 0  }
   0x7   :  { %s657_s13 = smov 0   ;;  %s659_s14 = smov 0  }
   0x8 LB: > { %s381_s15 = sadd.s32 4294967295, %s627_s14   ;;  %s382_s16 = sadd.s32 4294967294, %s627_s14   ;;  %s627_s14 = sphi %s659_s14, %s21_s14   ;;  %s623_s13 = sphi %s657_s13, %s889_s13   ;;  %s619_s12 = sphi %s655_s12, %s888_s12   ;;  %s615_s11 = sphi %s653_s11, %s887_s11   ;;  %s611_s10 = sphi %s651_s10, %s886_s10   ;;  %s607_s9 = sphi %s649_s9, %s885_s9  }
   0x9   : > { %s33_s17 = sadd.s32 1, %s623_s13  ;;  %s42_s18 = sadd.s32 1, %s615_s11 }
   0xa   : > { %p35_p0 = scmp.ge.s32.totalorder %s33_s17, 2  ;;  %p49_p1 = scmp.ne.s32.totalorder %s615_s11, %s611_s10 }
   0xb   : > { %p50_p2 = scmp.eq.s32.totalorder %s627_s14, 0  ;;  %p55_p3 = scmp.ne.s32.totalorder %s611_s10, %s607_s9 }
   0xc   : > { %s891_s17 = smov (%p35_p0, %s33_s17), 0  ;;  %p56_p5 = scmp.eq.s32.totalorder %s381_s15, 0 }
   0xd   : > { %p690_p4 = por %p50_p2, %p49_p1  ;;  %s37_s20 = ssub.s32 %s623_s13, %s891_s17 }
   0xe   : > { %p109_p6 = scmp.eq.s32.totalorder %s381_s15, 1  ;;  %p40_p7 = scmp.eq.s32.totalorder %s37_s20, 0 }
   0xf   : > { %p696_p8 = por %p56_p5, %p55_p3  ;;  %p115_p10 = scmp.eq.s32.totalorder %s382_s16, 1 }
  0x10   : > { %p700_p9 = por %p109_p6, %p49_p1  ;;  %p419_p13 = scmp.lt.s32.totalorder %s627_s14, 2 }
  0x11   : > { %s874_s21 = scalar_select %p696_p8, 1, 0 }
  0x12   : > { %s875_s22 = scalar_select %p700_p9, 1, 0 }
  0x13   : > { %s705_s23 = scalar_select %p40_p7, %s615_s11, %s42_s18  }
  0x14   : > { %p707_p11 = por %p115_p10, %p55_p3  ;;  %s714_s25 = sand.u32 1, %s615_s11  }
  0x15   : > { %s385_s26 = sshll.u32 %s714_s25, 3  ;;  %s401_s27 = sshll.u32 %s623_s13, 7 }
  0x16   : > { %s876_s24 = scalar_select %p707_p11, 1, 0 }
  0x17   : > { %s721_s30 = scalar_lea.hbm %s868_s0, %s401_s27  ;;  %s139_s3 = scalar_lea.vmem [#allocation2], %s385_s26 }
  0x18   : > { %s147_s4 = sshll.u32 %s139_s3, 4  ;;  %p727_p0 = pnand %p419_p13, %p690_p4  ;;  %s723_s4 = int_to_ptr.vmem [resolvable:$true] %s147_s4 }
  0x19   : > { %s136_s6 = scalar_lea.sflag [#allocation3], %s714_s25  ;;  %s481_s7 = scalar_lea.hbm %s721_s30, 128 }
  0x1a   : > { %p482_p2 = scmp.ne.s32.totalorder %s721_s30, %s481_s7  ;;  %p483_p3 = pneg %p727_p0 }
  0x1b   : > { %s486_s16 = scalar_lea.hbm %s868_s0, 256  ;;  %p487_p4 = scmp.lt.u32.totalorder %s721_s30, %s868_s0 }
  0x1c   : > { %p484_p5 = pnand %p483_p3, %p482_p2  ;;  %p488_p7 = scmp.lt.u32.totalorder %s486_s16, %s481_s7 }
  0x1d   : > { %p490_p13 = scmp.lt.u32.totalorder %s481_s7, %s721_s30 }
  0x1e   : > { %p485_p6 = pneg %p484_p5  ;;  %p489_p10 = por %p488_p7, %p487_p4 }
  0x20   : > { %p491_p12 = por %p490_p13, %p489_p10 }
  0x22   : > { %p492_p1 = pnand %p491_p12, %p485_p6 }
  0x24   : > { %495 = shalt.err (!%p492_p1)
}
  0x25   : > { %s496_s20 = scalar_lea.vmem %s723_s4, 128  ;;  %s629_s26 = smov [#allocation2]  }
  0x26   : > { %p497_p2 = scmp.ne.s32.totalorder %s723_s4, %s496_s20  ;;  %s501_s27 = sshll.u32 %s629_s26, 4  ;;  %s502_s27 = int_to_ptr.vmem [resolvable:$false] %s501_s27 }
  0x27   : > { %s503_s28 = scalar_lea.vmem %s502_s27, 256  ;;  %p504_p9 = scmp.lt.s32.totalorder %s723_s4, %s502_s27 }
  0x28   : > { %p499_p5 = pnand %p497_p2, %p483_p3  ;;  %p505_p4 = scmp.lt.s32.totalorder %s503_s28, %s496_s20 }
  0x2a   : > { %p500_p11 = pneg %p499_p5  ;;  %p506_p7 = por %p505_p4, %p504_p9 }
  0x2c   : > { %p507_p10 = pnand %p506_p7, %p500_p11 }
  0x2e   : > { %510 = shalt.err (!%p507_p10)
}
  0x2f   : > { %s630_s29 = smov 32   ;;  %s631_s3 = smov 2  }
  0x30   : > { %411 = dma.hbm_to_vmem [thread:$0]  (!%p727_p0), %s721_s30, 128, %s723_s4, %s136_s6, %s630_s29, %s630_s29, %s631_s3  }
  0x31   : > { %p174_p12 = scmp.lt.s32.totalorder %s627_s14, 3  ;;  %s388_s7 = sshll.u32 %s714_s25, 1 }
  0x32   : > { %s389_s8 = sshll.u32 %s623_s13, 5  ;;  %p878_p9 = scmp.ge.s32.totalorder %s627_s14, 1 }
  0x33   : > { %s772_s19 = scalar_lea.hbm %s869_s1, %s389_s8  ;;  %s161_s20 = scalar_lea.vmem [#allocation5], %s388_s7 }
  0x34   : > { %p765_p11 = pnand %p878_p9, %p174_p12  ;;  %s169_s26 = sshll.u32 %s161_s20, 4  ;;  %s170_s26 = int_to_ptr.vmem [resolvable:$true] %s169_s26 }
  0x35   : > { %s158_s30 = scalar_lea.sflag [#allocation6], %s714_s25  ;;  %s511_s4 = scalar_lea.hbm %s772_s19, 32 }
  0x36   : > { %s879_s15 = scalar_select %p765_p11, 1, 0 }
  0x37   : > { %p512_p1 = scmp.ne.s32.totalorder %s772_s19, %s511_s4  ;;  %s516_s28 = scalar_lea.hbm %s869_s1, 64 }
  0x38   : > { %p517_p2 = scmp.lt.u32.totalorder %s772_s19, %s869_s1  ;;  %p518_p5 = scmp.lt.u32.totalorder %s516_s28, %s511_s4 }
  0x39   : > { %p514_p6 = pnand %p512_p1, %p483_p3  ;;  %p520_p7 = scmp.lt.u32.totalorder %s511_s4, %s772_s19 }
  0x3a   : > { %p519_p4 = por %p518_p5, %p517_p2 }
  0x3b   : > { %p515_p13 = pneg %p514_p6 }
  0x3c   : > { %p521_p10 = por %p520_p7, %p519_p4 }
  0x3e   : > { %p522_p12 = pnand %p521_p10, %p515_p13 }
  0x40   : > { %525 = shalt.err (!%p522_p12)
}
  0x41   : > { %s526_s25 = scalar_lea.vmem %s170_s26, 32  ;;  %s632_s7 = smov [#allocation5]  }
  0x42   : > { %p527_p9 = scmp.ne.s32.totalorder %s170_s26, %s526_s25  ;;  %s531_s8 = sshll.u32 %s632_s7, 4  ;;  %s532_s8 = int_to_ptr.vmem [resolvable:$false] %s531_s8 }
  0x43   : > { %s533_s16 = scalar_lea.vmem %s532_s8, 64  ;;  %p534_p8 = scmp.lt.s32.totalorder %s170_s26, %s532_s8 }
  0x44   : > { %p529_p1 = pnand %p527_p9, %p483_p3  ;;  %p535_p11 = scmp.lt.s32.totalorder %s533_s16, %s526_s25 }
  0x46   : > { %p530_p6 = pneg %p529_p1  ;;  %p536_p2 = por %p535_p11, %p534_p8 }
  0x48   : > { %p537_p5 = pnand %p536_p2, %p530_p6 }
  0x4a   : > { %540 = shalt.err (!%p537_p5)
}
  0x4b   : > { %414 = dma.hbm_to_vmem [thread:$0]  (!%p727_p0), %s772_s19, 32, %s170_s26, %s158_s30  }
  0x4c   : > { %p880_p13 = scmp.ne.s32.totalorder %s879_s15, 0 }
  0x4d   : > { %s797_s18 = sand.u32 (!%p880_p13), 1, %s611_s10   ;;  %p881_p3 = scmp.ne.s32.totalorder (!%p880_p13), %s874_s21, 0 }
  0x4e   : > { %178 = sbr.rel (%p880_p13) target bundleno = 150 (0x96), region = 28  ;;  %s391_s20 = sshll.u32 (!%p880_p13), %s797_s18, 3 }
  0x4f   : > { %s181_s4 = scalar_lea.sflag (!%p880_p13), [#allocation3], %s797_s18  ;;  %s184_s6 = scalar_lea.vmem (!%p880_p13), [#allocation2], %s391_s20 }
  0x55   : > { %594 = dma.done.wait (%p881_p3), %s181_s4, 128  }
  0x56   : > { %596 = vsyncadd (%p881_p3), %s181_s4, 4294967168  ;;  %s392_s5 = sshll.u32 %s797_s18, 1  ;;  %s190_s15 = scalar_lea.sflag [#allocation6], %s797_s18 }
  0x57   : > { %s193_s19 = scalar_lea.vmem [#allocation5], %s392_s5 }
  0x58   : > { %598 = dma.done.wait (%p881_p3), %s190_s15, 32  }
  0x59   : > { %600 = vsyncadd (%p881_p3), %s190_s15, 4294967264  ;;  %v220_v0 = vld [vmem:[%s184_s6] sm:$0x3]  ;;  %v394_v1 = vld [vmem:[%s184_s6 + $0x2] sm:$0x3]  ;;  %s218_s21 = scalar_lea.vmem [#allocation7], %s392_s5 }
  0x5a   : > { %v225_v2 = vmax.f32 %v220_v0, %v394_v1  ;;  %v395_v3 = vld [vmem:[%s184_s6 + $0x4] sm:$0x3]  ;;  %v396_v4 = vld [vmem:[%s184_s6 + $0x6] sm:$0x3]  ;;  %v219_v21 = vld [vmem:[%s193_s19] sm:$0x3] }
  0x5b   : > { %vm221_vm0 = vcmp.eq.s32.totalorder %v219_v21, 0  ;;  %vm226_vm1 = vcmp.eq.s32.totalorder %v219_v21, 1  ;;  %vm231_vm2 = vcmp.eq.s32.totalorder %v219_v21, 2  ;;  %vm236_vm3 = vcmp.eq.s32.totalorder %v219_v21, 3  ;;  %s276_s26 = sshll.u32 %s218_s21, 4  ;;  %s398_s30 = sshll.u32 %s619_s12, 5  ;;  %s816_s26 = int_to_ptr.vmem [resolvable:$true] %s276_s26 }
  0x5c   : > { %v230_v5 = vmax.f32 %v225_v2, %v395_v3  ;;  %v222_v23 = vsel %vm221_vm0, %v220_v0, 0.0  ;;  %vm258_vm4 = vcmp.ne.s32.totalorder %v219_v21, 4294967196  ;;  %s821_s29 = scalar_lea.hbm %s870_s2, %s398_s30  ;;  %s262_s3 = scalar_lea.sflag [#allocation4], %s797_s18 }
  0x5d   : > { %v227_v24 = vsel %vm226_vm1, %v394_v1, %v222_v23  ;;  %s541_s25 = scalar_lea.vmem %s816_s26, 32  ;;  %p882_p0 = scmp.ne.s32.totalorder %s875_s22, 0 }
  0x5e   : > { %v235_v6 = vmax.f32 %v230_v5, %v396_v4  ;;  %v232_v25 = vsel %vm231_vm2, %v395_v3, %v227_v24  ;;  %p542_p8 = scmp.ne.s32.totalorder %s816_s26, %s541_s25  ;;  %s633_s12 = smov [#allocation7]  }
  0x5f   : > { %v237_v28 = vsel %vm236_vm3, %v396_v4, %v232_v25  ;;  %s545_s7 = sshll.u32 %s633_s12, 4  ;;  %s546_s7 = int_to_ptr.vmem [resolvable:$false] %s545_s7 }
  0x60   : > { %v238_v7 = vsub.f32 %v220_v0, %v235_v6  ;;  %v242_v8 = vsub.f32 %v394_v1, %v235_v6  ;;  %v246_v9 = vsub.f32 %v395_v3, %v235_v6  ;;  %v250_v10 = vsub.f32 %v396_v4, %v235_v6  ;;  %p543_p11 = pnand %p542_p8, %p882_p0  ;;  %s547_s8 = scalar_lea.vmem %s546_s7, 64 }
  0x61   : > { %p548_p7 = scmp.lt.s32.totalorder %s816_s26, %s546_s7  ;;  %p549_p10 = scmp.lt.s32.totalorder %s547_s8, %s541_s25 }
  0x62   : > { %v239_v11 = vmul.f32 1.442695, %v238_v7  ;;  %v243_v12 = vmul.f32 1.442695, %v242_v8  ;;  %v247_v13 = vmul.f32 1.442695, %v246_v9  ;;  %p544_p4 = pneg %p543_p11 }
  0x63   : > { %v251_v14 = vmul.f32 1.442695, %v250_v10  ;;  %p550_p12 = por %p549_p10, %p548_p7 }
  0x64   : > { %471 = vpow2.f32 %v239_v11 }
  0x65   : > { %473 = vpow2.f32 %v243_v12  ;;  %p551_p9 = pnand %p550_p12, %p544_p4 }
  0x66   : > { %475 = vpow2.f32 %v247_v13 }
  0x67   : > { %477 = vpow2.f32 %v251_v14 }
  0x6e   : > { %v472_v15 = vpop.eup %471 }
  0x6f   : > { %v474_v16 = vpop.eup %473 }
  0x70   : > { %v476_v17 = vpop.eup %475  ;;  %v245_v18 = vadd.f32 %v474_v16, %v472_v15 }
  0x71   : > { %v478_v19 = vpop.eup %477 }
  0x72   : > { %v249_v20 = vadd.f32 %v476_v17, %v245_v18 }
  0x74   : > { %v253_v22 = vadd.f32 %v478_v19, %v249_v20 }
  0x76   : > { %479 = vlog2.f32 %v253_v22 }
  0x80   : > { %v480_v26 = vpop.eup %479 }
  0x81   : > { %v255_v27 = vmul.f32 0.6931472, %v480_v26 }
  0x83   : > { %v256_v29 = vadd.f32 %v255_v27, %v235_v6 }
  0x85   : > { %v257_v30 = vsub.f32 %v256_v29, %v237_v28 }
  0x87   : > { %v259_v31 = vsel %vm258_vm4, %v257_v30, 0.0 }
  0x88   : > { %260 = vst [vmem:[%s218_s21] sm:$0x3] %v259_v31 }
  0x89   : > { %554 = shalt.err (!%p551_p9)
}
  0x8a   : > { %s555_s16 = scalar_lea.hbm %s821_s29, 32  ;;  %s559_s4 = scalar_lea.hbm %s870_s2, 64 }
  0x8b   : > { %p556_p1 = scmp.ne.s32.totalorder %s821_s29, %s555_s16  ;;  %p560_p5 = scmp.lt.u32.totalorder %s821_s29, %s870_s2 }
  0x8c   : > { %p561_p13 = scmp.lt.u32.totalorder %s559_s4, %s555_s16  ;;  %p563_p8 = scmp.lt.u32.totalorder %s555_s16, %s821_s29 }
  0x8d   : > { %p557_p6 = pnand %p556_p1, %p882_p0 }
  0x8e   : > { %p562_p3 = por %p561_p13, %p560_p5 }
  0x8f   : > { %p558_p2 = pneg %p557_p6 }
  0x90   : > { %p564_p11 = por %p563_p8, %p562_p3 }
  0x92   : > { %p565_p4 = pnand %p564_p11, %p558_p2 }
  0x94   : > { %568 = shalt.err (!%p565_p4)
}
  0x95   : > { %406 = dma.vmem_to_hbm [thread:$0]  (%p882_p0), %s816_s26, 32, %s821_s29, %s262_s3  }
  0x96 PF: > { %s288_s15 = sand.u32 1, %s607_s9   ;;  %p883_p7 = scmp.ne.s32.totalorder %s876_s24, 0 }
  0x97   : > { %p884_p10 = scmp.ge.s32.totalorder %s627_s14, 2  ;;  %s289_s19 = scalar_lea.sflag [#allocation4], %s288_s15 }
  0x99   : > { %p416_p12 = pnand %p884_p10, %p883_p7 }
  0x9b   : > { %602 = dma.done.wait (!%p416_p12), %s289_s19, 32  }
  0x9c   : > { %604 = vsyncadd (!%p416_p12), %s289_s19, 4294967264  ;;  %s21_s14 = sadd.s32 1, %s627_s14   ;;  %s885_s9 = smov %s611_s10 }
  0x9d   : > { %p18_p9 = scmp.ge.s32.totalorder %s21_s14, 4   ;;  %s886_s10 = smov %s615_s11 }
  0x9e   : > { %s887_s11 = smov %s705_s23  ;;  %s888_s12 = smov %s623_s13 }
  0x9f   : > { %s889_s13 = smov %s891_s17  ;;  %20 = sbr.rel (!%p18_p9) target bundleno = 8 (0x8), region = 89 }
  0xa6   :  { %294 = vsyncpa [#allocation3], 1 }
  0xa7   :  { %296 = vsyncpa [#allocation3 + $0x1], 1 }
  0xa8   :  { %297 = vsyncpa [#allocation6], 1 }
  0xa9   :  { %299 = vsyncpa [#allocation6 + $0x1], 1 }
  0xaa   :  { %300 = vsyncpa [#allocation4], 1 }
  0xab   :  { %302 = vsyncpa [#allocation4 + $0x1], 1 }

</bundles_post_ra>
